<compile_context>
chip_gen: v5e
topology: v5e:2x2
jax: 0.10.0
libtpu: 0.0.40
codegen_flags: <defaults>
</compile_context>

<pallas_src>
import jax
import jax.numpy as jnp
from jax.experimental import pallas as pl
from jax.experimental.pallas import tpu as pltpu


def selection_generator_kernel(left_ref, word_ref, right_ref, var_ref, mask_ref,
                               w1_ref, w2_ref, sel_ref, attn_ref):
    f32 = jnp.float32

    left = left_ref[...]        # [TB, C, E]   transport dtype (bf16 or f32)
    word = word_ref[...]        # [TB, E]
    right = right_ref[...]      # [TB, C, E]
    variants = var_ref[...]     # [TB, Vp, E]
    mask = mask_ref[...]        # [TB, Vp]     f32
    w1 = w1_ref[...]            # [E, E]
    w2 = w2_ref[...]            # [E, E]

    cdtype = left.dtype
    C = left.shape[1]
    inv_len = f32(1.0 / (2 * C + 1))

    # ---- encoder: BagOfEmbeddings mean over concat([left, word, right], dim=1) ----
    # (accumulate in f32; the sequence concat is never materialized)
    # TODO(synk): for very large C, stream C over an "arbitrary" grid axis instead
    # of keeping whole [TB, C, E] context blocks resident.
    summed = (jnp.sum(left.astype(f32), axis=1)
              + word.astype(f32)
              + jnp.sum(right.astype(f32), axis=1))
    encoded = summed * inv_len                                          # [TB, E] f32

    # ---- bilinear attention: keys = [encoded ; word];  proj = keys @ W ----
    # Lane-axis concat avoided: W split into W1 (encoded half) and W2 (word half).
    proj = (jnp.dot(encoded.astype(cdtype), w1, preferred_element_type=f32)
            + jnp.dot(word, w2, preferred_element_type=f32))            # [TB, E] f32

    # ---- scores[b, v] = proj[b] . variants[b, v]  (batched MXU contraction) ----
    proj3 = proj.astype(cdtype)[:, None, :]                             # [TB, 1, E]
    scores = jnp.einsum("bqe,bve->bqv", proj3, variants,
                        preferred_element_type=f32)[:, 0, :]            # [TB, Vp]

    # ---- masked softmax over variants ----
    keep = mask > 0.5
    masked_scores = jnp.where(keep, scores, f32(-1e30))
    m = jnp.max(masked_scores, axis=1, keepdims=True)
    e = jnp.exp(masked_scores - m) * keep.astype(f32)
    denom = jnp.maximum(jnp.sum(e, axis=1, keepdims=True), f32(1e-30))  # fully-masked guard
    attn = e * pl.reciprocal(denom, approx=True)                        # [TB, Vp]

    # ---- weighted_sum(variants, attention)  (batched MXU contraction) ----
    attn3 = attn.astype(cdtype)[:, None, :]                             # [TB, 1, Vp]
    selected = jnp.einsum("bqv,bve->bqe", attn3, variants,
                          preferred_element_type=f32)[:, 0, :]          # [TB, E]

    sel_ref[...] = selected.astype(sel_ref.dtype)
    attn_ref[...] = attn.astype(attn_ref.dtype)


def selection_generator_forward(left_context, word, right_context,
                                variants, variants_mask, bilinear_w,
                                *, batch_tile=512, transport_dtype=jnp.bfloat16):
    B, C, E = left_context.shape
    V = variants.shape[1]
    Vp = max(128, ((V + 127) // 128) * 128)   # lane-dense attention / MXU-aligned N

    # Pad the variants axis; padded entries are masked out -> exactly zero attention.
    variants_mask = variants_mask.astype(jnp.float32)
    if Vp != V:
        variants = jnp.pad(variants, ((0, 0), (0, Vp - V), (0, 0)))
        variants_mask = jnp.pad(variants_mask, ((0, 0), (0, Vp - V)))

    # Split the bilinear weight so the kernel never concatenates on the lane axis.
    w1 = bilinear_w[:E].astype(transport_dtype)
    w2 = bilinear_w[E:].astype(transport_dtype)

    # bf16 transport (halves HBM bytes on the big tensors); compute stays f32.
    left_context = left_context.astype(transport_dtype)
    word = word.astype(transport_dtype)
    right_context = right_context.astype(transport_dtype)
    variants = variants.astype(transport_dtype)

    # ---- batch tile sized against a conservative VMEM budget (v7x = 64 MiB phys) ----
    isz = jnp.dtype(transport_dtype).itemsize

    def footprint(tb):
        ins = (2 * tb * C * E + tb * E + tb * Vp * E) * isz + tb * Vp * 4
        outs = (tb * E + tb * Vp) * 4
        return 2 * (ins + outs) + 2 * E * E * isz   # double-buffered + resident W1/W2

    if B <= batch_tile:
        TB = B
    else:
        TB = max(8, (batch_tile // 8) * 8)
        while TB > 8 and footprint(TB) > 40 * 1024 * 1024:
            TB = max(8, ((TB // 2) // 8) * 8)

    vmem_limit = int(min(max(footprint(TB) + (8 << 20), 32 << 20), 48 << 20))
    grid = (pl.cdiv(B, TB),)

    sel, attn = pl.pallas_call(
        selection_generator_kernel,
        grid=grid,
        out_shape=(
            jax.ShapeDtypeStruct((B, E), jnp.float32),    # selected variants
            jax.ShapeDtypeStruct((B, Vp), jnp.float32),   # attention (lane-dense, padded)
        ),
        in_specs=[
            pl.BlockSpec((TB, C, E), lambda b: (b, 0, 0)),   # left context
            pl.BlockSpec((TB, E), lambda b: (b, 0)),         # word
            pl.BlockSpec((TB, C, E), lambda b: (b, 0, 0)),   # right context
            pl.BlockSpec((TB, Vp, E), lambda b: (b, 0, 0)),  # variants (padded)
            pl.BlockSpec((TB, Vp), lambda b: (b, 0)),        # variants mask (padded)
            pl.BlockSpec((E, E), lambda b: (0, 0)),          # W1 (resident across grid)
            pl.BlockSpec((E, E), lambda b: (0, 0)),          # W2 (resident across grid)
        ],
        out_specs=(
            pl.BlockSpec((TB, E), lambda b: (b, 0)),
            pl.BlockSpec((TB, Vp), lambda b: (b, 0)),
        ),
        compiler_params=pltpu.CompilerParams(
            dimension_semantics=("parallel",),   # batch axis shards across TCs on v7x
            vmem_limit_bytes=vmem_limit),
    )(left_context, word, right_context, variants, variants_mask, w1, w2)

    return sel, attn[:, :V]


# ----------------------------- references -----------------------------------

def reference_forward(left_context, word, right_context, variants, variants_mask, W):
    """Pure-f32 reference matching the PyTorch module semantics."""
    sent = jnp.concatenate([left_context, word[:, None, :], right_context], axis=1)
    encoded = jnp.mean(sent, axis=1)
    keys = jnp.concatenate([encoded, word], axis=1)
    scores = jnp.einsum("be,bve->bv", keys @ W, variants)
    keep = (variants_mask > 0.5).astype(jnp.float32)
    masked = jnp.where(keep > 0.5, scores, -1e30)
    e = jnp.exp(masked - masked.max(axis=1, keepdims=True)) * keep
    attn = e / jnp.maximum(e.sum(axis=1, keepdims=True), 1e-30)
    sel = jnp.einsum("bv,bve->be", attn, variants)
    return sel, attn


def mirrored_reference(left, word, right, variants, mask, W, cdt):
    """Reference that mirrors the kernel's transport-precision rounding points."""
    f32 = jnp.float32
    E = W.shape[1]
    C = left.shape[1]
    r = lambda x: x.astype(cdt).astype(f32)
    left_c, word_c, right_c, var_c = r(left), r(word), r(right), r(variants)
    w1, w2 = r(W[:E]), r(W[E:])
    encoded = (left_c.sum(axis=1) + word_c + right_c.sum(axis=1)) / (2 * C + 1)
    proj = r(encoded) @ w1 + word_c @ w2
    scores = jnp.einsum("be,bve->bv", r(proj), var_c)
    keep = (mask > 0.5).astype(f32)
    masked = jnp.where(keep > 0.5, scores, -1e30)
    e = jnp.exp(masked - masked.max(axis=1, keepdims=True)) * keep
    attn = e / jnp.maximum(e.sum(axis=1, keepdims=True), 1e-30)
    sel = jnp.einsum("bv,bve->be", r(attn), var_c)
    return sel, attn


if __name__ == "__main__":
    B, C, E, V = 2, 4, 32, 8

    key = jax.random.PRNGKey(0)
    k1, k2, k3, k4, k5 = jax.random.split(key, 5)

    left_context = jax.random.normal(k1, (B, C, E), dtype=jnp.float32)
    word = jax.random.normal(k2, (B, E), dtype=jnp.float32)
    right_context = jax.random.normal(k3, (B, C, E), dtype=jnp.float32)
    variants = jax.random.normal(k4, (B, V, E), dtype=jnp.float32)

    # mask: all variants valid for batch 0, last two masked out for batch 1
    variants_mask = jnp.ones((B, V), dtype=jnp.float32).at[1, -2:].set(0.0)

    bilinear_w = (jax.random.normal(k5, (2 * E, E), dtype=jnp.float32)
                  * (1.0 / jnp.sqrt(2.0 * E)))

    # --- exact-path check: f32 transport vs the pure-f32 (PyTorch-equivalent) reference ---
    sel32, attn32 = selection_generator_forward(
        left_context, word, right_context, variants, variants_mask, bilinear_w,
        transport_dtype=jnp.float32)
    jax.block_until_ready((sel32, attn32))
    ref_sel, ref_attn = reference_forward(
        left_context, word, right_context, variants, variants_mask, bilinear_w)

    assert sel32.shape == (B, E) and attn32.shape == (B, V)
    assert jnp.allclose(attn32, ref_attn, atol=5e-3, rtol=5e-3)
    assert jnp.allclose(sel32, ref_sel, atol=1e-2, rtol=1e-2)
    assert float(jnp.abs(attn32[1, -2:]).max()) == 0.0          # masked -> exactly zero
    assert jnp.allclose(attn32.sum(axis=1), 1.0, atol=1e-2)

    # --- default bf16-transport path vs a precision-mirrored reference ---
    sel16, attn16 = selection_generator_forward(
        left_context, word, right_context, variants, variants_mask, bilinear_w)
    jax.block_until_ready((sel16, attn16))
    mref_sel, mref_attn = mirrored_reference(
        left_context, word, right_context, variants, variants_mask, bilinear_w,
        jnp.bfloat16)

    assert sel16.shape == (B, E) and attn16.shape == (B, V)
    assert jnp.allclose(attn16, mref_attn, atol=5e-3, rtol=1e-2)
    assert jnp.allclose(sel16, mref_sel, atol=1e-2, rtol=1e-2)
    assert float(jnp.abs(attn16[1, -2:]).max()) == 0.0

    print("KERNEL_OK")
</pallas_src>

<mosaic_0001>
module attributes {stable_mosaic.version = 11 : i64} {
  func.func @selection_generator_kernel(%arg0: i32, %arg1: memref<2x4x32xf32, #tpu.memory_space<vmem>>, %arg2: memref<2x32xf32, #tpu.memory_space<vmem>>, %arg3: memref<2x4x32xf32, #tpu.memory_space<vmem>>, %arg4: memref<2x128x32xf32, #tpu.memory_space<vmem>>, %arg5: memref<2x128xf32, #tpu.memory_space<vmem>>, %arg6: memref<32x32xf32, #tpu.memory_space<vmem>>, %arg7: memref<32x32xf32, #tpu.memory_space<vmem>>, %arg8: memref<2x32xf32, #tpu.memory_space<vmem>>, %arg9: memref<2x128xf32, #tpu.memory_space<vmem>>) attributes {dimension_semantics = [#tpu.dimension_semantics<parallel>], iteration_bounds = array<i64: 1>, scalar_prefetch = 0 : i64, scratch_operands = 0 : i64, tpu.core_type = #tpu.core_type<tc>, window_params = [{transform_indices = @transform_0, window_bounds = array<i64: 2, 4, 32>}, {transform_indices = @transform_1, window_bounds = array<i64: 2, 32>}, {transform_indices = @transform_2, window_bounds = array<i64: 2, 4, 32>}, {transform_indices = @transform_3, window_bounds = array<i64: 2, 128, 32>}, {transform_indices = @transform_4, window_bounds = array<i64: 2, 128>}, {pipeline_mode = #tpu.pipeline_mode<synchronous>, transform_indices = @transform_5, window_bounds = array<i64: 32, 32>}, {pipeline_mode = #tpu.pipeline_mode<synchronous>, transform_indices = @transform_6, window_bounds = array<i64: 32, 32>}, {transform_indices = @transform_7, window_bounds = array<i64: 2, 32>}, {transform_indices = @transform_8, window_bounds = array<i64: 2, 128>}]} {
    %c0 = arith.constant 0 : index
    %c0_0 = arith.constant 0 : index
    %c0_1 = arith.constant 0 : index
    %0 = vector.load %arg1[%c0, %c0_0, %c0_1] : memref<2x4x32xf32, #tpu.memory_space<vmem>>, vector<2x4x32xf32>
    %c0_2 = arith.constant 0 : index
    %c0_3 = arith.constant 0 : index
    %1 = vector.load %arg2[%c0_2, %c0_3] : memref<2x32xf32, #tpu.memory_space<vmem>>, vector<2x32xf32>
    %c0_4 = arith.constant 0 : index
    %c0_5 = arith.constant 0 : index
    %c0_6 = arith.constant 0 : index
    %2 = vector.load %arg3[%c0_4, %c0_5, %c0_6] : memref<2x4x32xf32, #tpu.memory_space<vmem>>, vector<2x4x32xf32>
    %c0_7 = arith.constant 0 : index
    %c0_8 = arith.constant 0 : index
    %c0_9 = arith.constant 0 : index
    %3 = vector.load %arg4[%c0_7, %c0_8, %c0_9] : memref<2x128x32xf32, #tpu.memory_space<vmem>>, vector<2x128x32xf32>
    %c0_10 = arith.constant 0 : index
    %c0_11 = arith.constant 0 : index
    %4 = vector.load %arg5[%c0_10, %c0_11] : memref<2x128xf32, #tpu.memory_space<vmem>>, vector<2x128xf32>
    %c0_12 = arith.constant 0 : index
    %c0_13 = arith.constant 0 : index
    %5 = vector.load %arg6[%c0_12, %c0_13] : memref<32x32xf32, #tpu.memory_space<vmem>>, vector<32x32xf32>
    %c0_14 = arith.constant 0 : index
    %c0_15 = arith.constant 0 : index
    %6 = vector.load %arg7[%c0_14, %c0_15] : memref<32x32xf32, #tpu.memory_space<vmem>>, vector<32x32xf32>
    %cst = arith.constant dense<0.000000e+00> : vector<2x32xf32>
    %7 = vector.multi_reduction <add>, %0, %cst [1] : vector<2x4x32xf32> to vector<2x32xf32>
    %8 = arith.addf %7, %1 : vector<2x32xf32>
    %cst_16 = arith.constant dense<0.000000e+00> : vector<2x32xf32>
    %9 = vector.multi_reduction <add>, %2, %cst_16 [1] : vector<2x4x32xf32> to vector<2x32xf32>
    %10 = arith.addf %8, %9 : vector<2x32xf32>
    %cst_17 = arith.constant 0.111111112 : f32
    %11 = vector.broadcast %cst_17 : f32 to vector<2x32xf32>
    %12 = arith.mulf %10, %11 : vector<2x32xf32>
    %cst_18 = arith.constant dense<0.000000e+00> : vector<2x32xf32>
    %13 = tpu.matmul %12, %5, %cst_18 {dimension_numbers = #tpu.dot_dimension_numbers<[1], [0], [0], [1], [0, 0, 1, 1], [], []>} : vector<2x32xf32>, vector<32x32xf32>, vector<2x32xf32> -> vector<2x32xf32>
    %cst_19 = arith.constant dense<0.000000e+00> : vector<2x32xf32>
    %14 = tpu.matmul %1, %6, %cst_19 {dimension_numbers = #tpu.dot_dimension_numbers<[1], [0], [0], [1], [0, 0, 1, 1], [], []>} : vector<2x32xf32>, vector<32x32xf32>, vector<2x32xf32> -> vector<2x32xf32>
    %15 = arith.addf %13, %14 : vector<2x32xf32>
    %16 = vector.shape_cast %15 : vector<2x32xf32> to vector<2x1x32xf32>
    "tpu.trace_start"() <{level = 10 : i32, message = "bqe,bve->bqv"}> : () -> ()
    %cst_20 = arith.constant dense<0.000000e+00> : vector<2x1x128xf32>
    %17 = tpu.matmul %16, %3, %cst_20 {dimension_numbers = #tpu.dot_dimension_numbers<[2], [2], [1], [1], [0, 0, 0, 1, 1, 1], [0], [0]>} : vector<2x1x32xf32>, vector<2x128x32xf32>, vector<2x1x128xf32> -> vector<2x1x128xf32>
    "tpu.trace_stop"() : () -> ()
    %18 = vector.shape_cast %17 : vector<2x1x128xf32> to vector<2x128xf32>
    %cst_21 = arith.constant 5.000000e-01 : f32
    %19 = vector.broadcast %cst_21 : f32 to vector<2x128xf32>
    %20 = arith.cmpf ogt, %4, %19 : vector<2x128xf32>
    %cst_22 = arith.constant -1.000000e+30 : f32
    %21 = vector.broadcast %cst_22 : f32 to vector<2x128xf32>
    %22 = arith.select %20, %18, %21 : vector<2x128xi1>, vector<2x128xf32>
    %cst_23 = arith.constant dense<0xFF800000> : vector<2xf32>
    %23 = vector.multi_reduction <maximumf>, %22, %cst_23 [1] : vector<2x128xf32> to vector<2xf32>
    %24 = vector.shape_cast %23 : vector<2xf32> to vector<2x1xf32>
    %25 = vector.broadcast %24 : vector<2x1xf32> to vector<2x128xf32>
    %26 = arith.subf %22, %25 : vector<2x128xf32>
    %27 = math.exp %26 : vector<2x128xf32>
    %28 = arith.extui %20 : vector<2x128xi1> to vector<2x128xi32>
    %29 = arith.sitofp %28 : vector<2x128xi32> to vector<2x128xf32>
    %30 = arith.mulf %27, %29 : vector<2x128xf32>
    %cst_24 = arith.constant dense<0.000000e+00> : vector<2xf32>
    %31 = vector.multi_reduction <add>, %30, %cst_24 [1] : vector<2x128xf32> to vector<2xf32>
    %32 = vector.shape_cast %31 : vector<2xf32> to vector<2x1xf32>
    %cst_25 = arith.constant 1.000000e-30 : f32
    %33 = vector.broadcast %cst_25 : f32 to vector<2x1xf32>
    %34 = arith.maximumf %32, %33 : vector<2x1xf32>
    %35 = tpu.reciprocal %34 {approx = true} : vector<2x1xf32> -> vector<2x1xf32>
    %36 = vector.broadcast %35 : vector<2x1xf32> to vector<2x128xf32>
    %37 = arith.mulf %30, %36 : vector<2x128xf32>
    %38 = vector.shape_cast %37 : vector<2x128xf32> to vector<2x1x128xf32>
    "tpu.trace_start"() <{level = 10 : i32, message = "bqv,bve->bqe"}> : () -> ()
    %cst_26 = arith.constant dense<0.000000e+00> : vector<2x1x32xf32>
    %39 = tpu.matmul %38, %3, %cst_26 {dimension_numbers = #tpu.dot_dimension_numbers<[2], [1], [1], [2], [0, 0, 0, 1, 1, 2], [0], [0]>} : vector<2x1x128xf32>, vector<2x128x32xf32>, vector<2x1x32xf32> -> vector<2x1x32xf32>
    "tpu.trace_stop"() : () -> ()
    %40 = vector.shape_cast %39 : vector<2x1x32xf32> to vector<2x32xf32>
    %c0_27 = arith.constant 0 : index
    %c0_28 = arith.constant 0 : index
    %41 = vector.load %arg8[%c0_27, %c0_28] : memref<2x32xf32, #tpu.memory_space<vmem>>, vector<2x32xf32>
    tpu.vector_store %arg8[%c0_27, %c0_28], %40 {strides = array<i32>} : memref<2x32xf32, #tpu.memory_space<vmem>>, vector<2x32xf32>,
    %c0_29 = arith.constant 0 : index
    %c0_30 = arith.constant 0 : index
    %42 = vector.load %arg9[%c0_29, %c0_30] : memref<2x128xf32, #tpu.memory_space<vmem>>, vector<2x128xf32>
    tpu.vector_store %arg9[%c0_29, %c0_30], %37 {strides = array<i32>} : memref<2x128xf32, #tpu.memory_space<vmem>>, vector<2x128xf32>,
    return
  }
  func.func @transform_0(%arg0: i32) -> (i32, i32, i32) {
    %c0_i32 = arith.constant 0 : i32
    %c0_i32_0 = arith.constant 0 : i32
    %c0_i32_1 = arith.constant 0 : i32
    return %arg0, %c0_i32, %c0_i32_0 : i32, i32, i32
  }
  func.func @transform_1(%arg0: i32) -> (i32, i32) {
    %c0_i32 = arith.constant 0 : i32
    %c0_i32_0 = arith.constant 0 : i32
    return %arg0, %c0_i32 : i32, i32
  }
  func.func @transform_2(%arg0: i32) -> (i32, i32, i32) {
    %c0_i32 = arith.constant 0 : i32
    %c0_i32_0 = arith.constant 0 : i32
    %c0_i32_1 = arith.constant 0 : i32
    return %arg0, %c0_i32, %c0_i32_0 : i32, i32, i32
  }
  func.func @transform_3(%arg0: i32) -> (i32, i32, i32) {
    %c0_i32 = arith.constant 0 : i32
    %c0_i32_0 = arith.constant 0 : i32
    %c0_i32_1 = arith.constant 0 : i32
    return %arg0, %c0_i32, %c0_i32_0 : i32, i32, i32
  }
  func.func @transform_4(%arg0: i32) -> (i32, i32) {
    %c0_i32 = arith.constant 0 : i32
    %c0_i32_0 = arith.constant 0 : i32
    return %arg0, %c0_i32 : i32, i32
  }
  func.func @transform_5(%arg0: i32) -> (i32, i32) {
    %c0_i32 = arith.constant 0 : i32
    %c0_i32_0 = arith.constant 0 : i32
    %c0_i32_1 = arith.constant 0 : i32
    return %c0_i32, %c0_i32_0 : i32, i32
  }
  func.func @transform_6(%arg0: i32) -> (i32, i32) {
    %c0_i32 = arith.constant 0 : i32
    %c0_i32_0 = arith.constant 0 : i32
    %c0_i32_1 = arith.constant 0 : i32
    return %c0_i32, %c0_i32_0 : i32, i32
  }
  func.func @transform_7(%arg0: i32) -> (i32, i32) {
    %c0_i32 = arith.constant 0 : i32
    %c0_i32_0 = arith.constant 0 : i32
    return %arg0, %c0_i32 : i32, i32
  }
  func.func @transform_8(%arg0: i32) -> (i32, i32) {
    %c0_i32 = arith.constant 0 : i32
    %c0_i32_0 = arith.constant 0 : i32
    return %arg0, %c0_i32 : i32, i32
  }
}

</mosaic_0001>

<bundles_post_ra>
// kernel: tpu_custom_call.1
= control target key start
LH: loop header
LB: loop body
LE: loop exit
PB: predicated region body
PF: predicated region fallthrough
CT: control target
= control target key end

     0   :  { %14 = vsyncpa [#allocation3], 0  ;;  %vm76_vm0 = vcmask 257024   ;;  %vm115_vm1 = vcmask 261120   ;;  %s744_s0 = inlined_call_operand.vmem [shape: f32[2,4,32], index: 0, kind: input, shape index: {}]   ;;  %s745_s1 = inlined_call_operand.vmem [shape: f32[2,32], index: 1, kind: input, shape index: {}]   ;;  %s746_s2 = inlined_call_operand.vmem [shape: f32[2,4,32], index: 2, kind: input, shape index: {}]   ;;  %s747_s3 = inlined_call_operand.vmem [shape: f32[2,128,32], index: 3, kind: input, shape index: {}]   ;;  %s748_s4 = inlined_call_operand.vmem [shape: f32[2,128], index: 4, kind: input, shape index: {}]   ;;  %s749_s5 = inlined_call_operand.vmem [shape: f32[32,32], index: 5, kind: input, shape index: {}]   ;;  %s750_s6 = inlined_call_operand.vmem [shape: f32[32,32], index: 6, kind: input, shape index: {}]   ;;  %s751_s7 = inlined_call_operand.hbm [shape: f32[2,32], index: 7, kind: output, shape index: {0}]   ;;  %s752_s8 = inlined_call_operand.hbm [shape: f32[2,128], index: 8, kind: output, shape index: {1}]  }
   0x1   :  { %v75_v0 = vld [vmem:[%s750_s6 + $0x18] sm:$0xff]  ;;  %v74_v2 = vld [vmem:[%s750_s6 + $0x10] sm:$0xff]  ;;  %v73_v4 = vld [vmem:[%s750_s6 + $0x8] sm:$0xff] }
   0x2   :  { %v71_v1 = vld [vmem:[%s749_s5 + $0x18] sm:$0xff]  ;;  %130 = vmatpush.msra.mxu0 %v75_v0  ;;  %v70_v3 = vld [vmem:[%s749_s5 + $0x10] sm:$0xff]  ;;  %v69_v5 = vld [vmem:[%s749_s5 + $0x8] sm:$0xff] }
   0x3   :  { %157 = vmatpush.msra.mxu1 %v71_v1  ;;  %v30_v6 = vld [vmem:[%s744_s0] sm:$0xf]  ;;  %v31_v8 = vld [vmem:[%s744_s0 + $0x4] sm:$0xf]  ;;  %v50_v19 = vld [vmem:[%s747_s3 + $0x78] sm:$0xff] }
   0x4   :  { %131 = vmatpush.msra.mxu0 %v74_v2  ;;  %v72_v7 = vld [vmem:[%s750_s6] sm:$0xff]  ;;  %v77_v11 = vsel %vm76_vm0, %v30_v6, 0.0  ;;  %v84_v12 = vsel %vm76_vm0, %v31_v8, 0.0  ;;  %v66_v20 = vld [vmem:[%s747_s3 + $0xf8] sm:$0xff]  ;;  %415 = vmatpush.xpose.msk.msra.mxu2 %vm115_vm1, %v50_v19  ;;  %v49_v26 = vld [vmem:[%s747_s3 + $0x70] sm:$0xff] }
   0x5   :  { %158 = vmatpush.msra.mxu1 %v70_v3  ;;  %v33_v9 = vld [vmem:[%s746_s2] sm:$0xf]  ;;  %v34_v14 = vld [vmem:[%s746_s2 + $0x4] sm:$0xf]  ;;  %v78_v15 = vrot.slane %v77_v11, 4  ;;  %v85_v16 = vrot.slane %v84_v12, 4  ;;  %432 = vmatpush.xpose.msk.msra.mxu3 %vm115_vm1, %v66_v20 }
   0x6   :  { %v68_v10 = vld [vmem:[%s749_s5] sm:$0xff]  ;;  %v97_v13 = vsel %vm76_vm0, %v33_v9, 0.0  ;;  %132 = vmatpush.msra.mxu0 %v73_v4  ;;  %v104_v18 = vsel %vm76_vm0, %v34_v14, 0.0  ;;  %v65_v27 = vld [vmem:[%s747_s3 + $0xf0] sm:$0xff]  ;;  %v48_v36 = vld [vmem:[%s747_s3 + $0x68] sm:$0xff] }
   0x7   :  { %159 = vmatpush.msra.mxu1 %v69_v5  ;;  %v98_v17 = vrot.slane %v97_v13, 4  ;;  %v105_v21 = vrot.slane %v104_v18, 4  ;;  %v32_v22 = vld [vmem:[%s745_s1] sm:$0x3]  ;;  %v79_v23 = vadd.f32 %v78_v15, %v77_v11  ;;  %v86_v24 = vadd.f32 %v85_v16, %v84_v12  ;;  %v64_v37 = vld [vmem:[%s747_s3 + $0xe8] sm:$0xff] }
   0x8   :  { %133 = vmatpush.msra.mxu0 %v72_v7  ;;  %416 = vmatpush.xpose.msk.msra.mxu2 %vm115_vm1, %v49_v26 }
   0x9   :  { %160 = vmatpush.msra.mxu1 %v68_v10  ;;  %v99_v25 = vadd.f32 %v98_v17, %v97_v13  ;;  %413 = vmatmul.msk.f32.vlgmr.msra.gmra.mxu0 %vm115_vm1, %v32_v22  ;;  %v106_v28 = vadd.f32 %v105_v21, %v104_v18  ;;  %v80_v29 = vrot.slane %v79_v23, 2  ;;  %v87_v30 = vrot.slane %v86_v24, 2 }
   0xa   :  { %333 = vmatpush.msrb.mxu0 %v50_v19  ;;  %433 = vmatpush.xpose.msk.msra.mxu3 %vm115_vm1, %v65_v27 }
   0xb   :  { %353 = vmatpush.msrb.mxu1 %v66_v20  ;;  %v100_v31 = vrot.slane %v99_v25, 2  ;;  %v107_v32 = vrot.slane %v106_v28, 2  ;;  %v81_v33 = vadd.f32 %v80_v29, %v79_v23  ;;  %v88_v34 = vadd.f32 %v87_v30, %v86_v24 }
   0xc   :  { %334 = vmatpush.msrb.mxu0 %v49_v26 }
   0xd   :  { %v101_v35 = vadd.f32 %v100_v31, %v99_v25  ;;  %354 = vmatpush.msrb.mxu1 %v65_v27  ;;  %v108_v38 = vadd.f32 %v107_v32, %v106_v28 }
   0xe   :  { %15 = vsyncpa [#allocation5], 0  ;;  %v82_v39 = vrot.slane %v81_v33, 1  ;;  %v89_v40 = vrot.slane %v88_v34, 1  ;;  %v92_v41 = vrot.slane %v32_v22, 1  ;;  %335 = vmatpush.msrb.mxu0 %v48_v36  ;;  %417 = vmatpush.xpose.msk.msra.mxu2 %vm115_vm1, %v48_v36  ;;  %v47_v44 = vld [vmem:[%s747_s3 + $0x60] sm:$0xff] }
   0xf   :  { %v102_v42 = vrot.slane %v101_v35, 1  ;;  %355 = vmatpush.msrb.mxu1 %v64_v37  ;;  %v109_v43 = vrot.slane %v108_v38, 1  ;;  %434 = vmatpush.xpose.msk.msra.mxu3 %vm115_vm1, %v64_v37  ;;  %v63_v45 = vld [vmem:[%s747_s3 + $0xe0] sm:$0xff]  ;;  %v46_v50 = vld [vmem:[%s747_s3 + $0x58] sm:$0xff]  ;;  %v45_v54 = vld [vmem:[%s747_s3 + $0x50] sm:$0xff]  ;;  %vm141_vm2 = vcmask 1041409  }
  0x10   :  { %v83_v46 = vadd.f32 %v82_v39, %v81_v33  ;;  %v90_v47 = vadd.f32 %v89_v40, %v88_v34  ;;  %336 = vmatpush.msrb.mxu0 %v47_v44  ;;  %v62_v51 = vld [vmem:[%s747_s3 + $0xd8] sm:$0xff]  ;;  %v61_v55 = vld [vmem:[%s747_s3 + $0xd0] sm:$0xff]  ;;  %v44_v58 = vld [vmem:[%s747_s3 + $0x48] sm:$0xff]  ;;  %vm314_vm4 = vcmask 1041408   ;;  %v509_v32 = vmov 0.0   ;;  %s399_s18 = sshll.u32 %s752_s8, 4  ;;  %s400_s18 = int_to_ptr.hbm [resolvable:$true] %s399_s18 }
  0x11   :  { %v103_v48 = vadd.f32 %v102_v42, %v101_v35  ;;  %356 = vmatpush.msrb.mxu1 %v63_v45  ;;  %v110_v49 = vadd.f32 %v109_v43, %v108_v38  ;;  %v60_v59 = vld [vmem:[%s747_s3 + $0xc8] sm:$0xff]  ;;  %v43_v62 = vld [vmem:[%s747_s3 + $0x40] sm:$0xff]  ;;  %v42_v1 = vld [vmem:[%s747_s3 + $0x38] sm:$0xff]  ;;  %s511_s19 = smov [#allocation2]   ;;  %s388_s23 = sshll.u32 %s751_s7, 4  ;;  %vm378_vm5 = vcmask 254976   ;;  %s389_s23 = int_to_ptr.hbm [resolvable:$true] %s388_s23 }
  0x12   :  { %v95_v52 = vadd.f32 %v83_v46, %v32_v22  ;;  %v96_v53 = vadd.f32 %v92_v41, %v90_v47  ;;  %337 = vmatpush.msrb.mxu0 %v46_v50  ;;  %418 = vmatpush.xpose.msk.msra.mxu2 %vm115_vm1, %v47_v44  ;;  %v59_v63 = vld [vmem:[%s747_s3 + $0xc0] sm:$0xff]  ;;  %v58_v2 = vld [vmem:[%s747_s3 + $0xb8] sm:$0xff]  ;;  %v41_v4 = vld [vmem:[%s747_s3 + $0x30] sm:$0xff]  ;;  %s386_s20 = sshll.u32 %s511_s19, 4  ;;  %s387_s20 = int_to_ptr.vmem [resolvable:$true] %s386_s20 }
  0x13   :  { %357 = vmatpush.msrb.mxu1 %v62_v51  ;;  %435 = vmatpush.xpose.msk.msra.mxu3 %vm115_vm1, %v63_v45  ;;  %v57_v5 = vld [vmem:[%s747_s3 + $0xb0] sm:$0xff]  ;;  %v40_v6 = vld [vmem:[%s747_s3 + $0x28] sm:$0xff]  ;;  %v39_v8 = vld [vmem:[%s747_s3 + $0x20] sm:$0xff] }
  0x14   :  { %v111_v56 = vadd.f32 %v103_v48, %v95_v52  ;;  %v112_v57 = vadd.f32 %v110_v49, %v96_v53  ;;  %338 = vmatpush.msrb.mxu0 %v45_v54  ;;  %v56_v7 = vld [vmem:[%s747_s3 + $0xa8] sm:$0xff]  ;;  %v55_v9 = vld [vmem:[%s747_s3 + $0xa0] sm:$0xff]  ;;  %v38_v10 = vld [vmem:[%s747_s3 + $0x18] sm:$0xff] }
  0x15   :  { %358 = vmatpush.msrb.mxu1 %v61_v55  ;;  %v54_v11 = vld [vmem:[%s747_s3 + $0x98] sm:$0xff]  ;;  %v37_v12 = vld [vmem:[%s747_s3 + $0x10] sm:$0xff]  ;;  %v36_v14 = vld [vmem:[%s747_s3 + $0x8] sm:$0xff] }
  0x16   :  { %v113_v60 = vmul.f32 0.11111111, %v111_v56  ;;  %v114_v61 = vmul.f32 0.11111111, %v112_v57  ;;  %339 = vmatpush.msrb.mxu0 %v44_v58  ;;  %419 = vmatpush.xpose.msk.msra.mxu2 %vm115_vm1, %v46_v50  ;;  %v53_v13 = vld [vmem:[%s747_s3 + $0x90] sm:$0xff]  ;;  %v52_v15 = vld [vmem:[%s747_s3 + $0x88] sm:$0xff] }
  0x17   :  { %359 = vmatpush.msrb.mxu1 %v60_v59  ;;  %436 = vmatpush.xpose.msk.msra.mxu3 %vm115_vm1, %v62_v51  ;;  %v35_v16 = vld [vmem:[%s747_s3] sm:$0xff] }
  0x18   :  { %v140_v0 = vrot.slane %v114_v61, 7  ;;  %340 = vmatpush.msrb.mxu0 %v43_v62  ;;  %v51_v17 = vld [vmem:[%s747_s3 + $0x80] sm:$0xff]  ;;  %s510_s3 = smov [#allocation4]  }
  0x19   :  { %360 = vmatpush.msrb.mxu1 %v59_v63  ;;  %v67_v22 = vld [vmem:[%s748_s4] sm:$0x3]  ;;  %s397_s4 = sshll.u32 %s510_s3, 4  ;;  %s398_s4 = int_to_ptr.vmem [resolvable:$true] %s397_s4 }
  0x1a   :  { %v142_v3 = vsel %vm141_vm2, %v140_v0, %v113_v60  ;;  %341 = vmatpush.msrb.mxu0 %v42_v1  ;;  %420 = vmatpush.xpose.msk.msra.mxu2 %vm115_vm1, %v45_v54  ;;  %vm307_vm3 = vcmp.gt.f32.partialorder %v67_v22, 0.5 }
  0x1b   :  { %361 = vmatpush.msrb.mxu1 %v58_v2  ;;  %437 = vmatpush.xpose.msk.msra.mxu3 %vm115_vm1, %v61_v55  ;;  %v449_v33 = vsel %vm307_vm3, 1.0, %v509_v32 }
  0x1c   :  { %414 = vmatmul.msk.f32.vlgmr.msra.gmra.mxu1 %vm115_vm1, %v142_v3  ;;  %342 = vmatpush.msrb.mxu0 %v41_v4 }
  0x1d   :  { %362 = vmatpush.msrb.mxu1 %v57_v5 }
  0x1e   :  { %343 = vmatpush.msrb.mxu0 %v40_v6  ;;  %421 = vmatpush.xpose.msk.msra.mxu2 %vm115_vm1, %v44_v58 }
  0x1f   :  { %363 = vmatpush.msrb.mxu1 %v56_v7  ;;  %438 = vmatpush.xpose.msk.msra.mxu3 %vm115_vm1, %v60_v59 }
  0x20   :  { %344 = vmatpush.msrb.mxu0 %v39_v8 }
  0x21   :  { %364 = vmatpush.msrb.mxu1 %v55_v9 }
  0x22   :  { %345 = vmatpush.msrb.mxu0 %v38_v10  ;;  %422 = vmatpush.xpose.msk.msra.mxu2 %vm115_vm1, %v43_v62 }
  0x23   :  { %365 = vmatpush.msrb.mxu1 %v54_v11  ;;  %439 = vmatpush.xpose.msk.msra.mxu3 %vm115_vm1, %v59_v63 }
  0x24   :  { %346 = vmatpush.msrb.mxu0 %v37_v12 }
  0x25   :  { %366 = vmatpush.msrb.mxu1 %v53_v13 }
  0x26   :  { %347 = vmatpush.msrb.mxu0 %v36_v14  ;;  %423 = vmatpush.xpose.msk.msra.mxu2 %vm115_vm1, %v42_v1 }
  0x27   :  { %367 = vmatpush.msrb.mxu1 %v52_v15  ;;  %440 = vmatpush.xpose.msk.msra.mxu3 %vm115_vm1, %v58_v2 }
  0x28   :  { %348 = vmatpush.msrb.mxu0 %v35_v16 }
  0x29   :  { %368 = vmatpush.msrb.mxu1 %v51_v17 }
  0x2a   :  { %424 = vmatpush.xpose.msk.msra.mxu2 %vm115_vm1, %v41_v4 }
  0x2b   :  { %441 = vmatpush.xpose.msk.msra.mxu3 %vm115_vm1, %v57_v5 }
  0x2e   :  { %425 = vmatpush.xpose.msk.msra.mxu2 %vm115_vm1, %v40_v6 }
  0x2f   :  { %442 = vmatpush.xpose.msk.msra.mxu3 %vm115_vm1, %v56_v7 }
  0x32   :  { %426 = vmatpush.xpose.msk.msra.mxu2 %vm115_vm1, %v39_v8 }
  0x33   :  { %443 = vmatpush.xpose.msk.msra.mxu3 %vm115_vm1, %v55_v9 }
  0x36   :  { %427 = vmatpush.xpose.msk.msra.mxu2 %vm115_vm1, %v38_v10 }
  0x37   :  { %444 = vmatpush.xpose.msk.msra.mxu3 %vm115_vm1, %v54_v11 }
  0x3a   :  { %428 = vmatpush.xpose.msk.msra.mxu2 %vm115_vm1, %v37_v12 }
  0x3b   :  { %445 = vmatpush.xpose.msk.msra.mxu3 %vm115_vm1, %v53_v13 }
  0x3e   :  { %429 = vmatpush.xpose.msk.msra.mxu2 %vm115_vm1, %v36_v14 }
  0x3f   :  { %446 = vmatpush.xpose.msk.msra.mxu3 %vm115_vm1, %v52_v15 }
  0x42   :  { %430 = vmatpush.xpose.msk.msra.mxu2 %vm115_vm1, %v35_v16 }
  0x43   :  { %447 = vmatpush.xpose.msk.msra.mxu3 %vm115_vm1, %v51_v17 }
  0x86   :  { %v135_v18 = vpop.f32.mrf.mxu0 }
  0x99   :  { %v162_v19 = vpop.f32.mrf.mxu1 }
  0x9a   :  { %v163_v20 = vadd.f32 %v162_v19, %v135_v18 }
  0x9c   :  { %v166_v21 = vrot.slane %v163_v20, 1  ;;  %431 = vmatmul.msk.f32.vlgmr.msra.gmra.mxu2 %vm115_vm1, %v163_v20 }
  0x9e   :  { %448 = vmatmul.msk.f32.vlgmr.msra.gmra.mxu3 %vm115_vm1, %v166_v21 }
 0x11f   :  { %v234_v25 = vpop.f32.mrf.mxu2 }
 0x121   :  { %v304_v23 = vpop.f32.mrf.mxu3 }
 0x122   :  { %v310_v24 = vrot.slane %v304_v23, 7 }
 0x124   :  { %v311_v26 = vsel %vm141_vm2, %v310_v24, %v234_v25 }
 0x125   :  { %v313_v27 = vsel %vm307_vm3, %v311_v26, -1e+30 }
 0x126   :  { %v315_v28 = vsel %vm314_vm4, %v313_v27, -inf }
 0x127   :  { %316 = vmax.xlane.f32.xlu0 %v315_v28 }
 0x19a   :  { %v317_v29 = vpop.xlane.xlu0 %316 }
 0x19b   :  { %v318_v30 = vsub.f32 %v313_v27, %v317_v29 }
 0x19d   :  { %v319_v31 = vmul.f32 1.442695, %v318_v30 }
 0x19f   :  { %453 = vpow2.f32 %v319_v31 }
 0x1a5   :  { %v454_v34 = vpop.eup %453 }
 0x1a6   :  { %v323_v35 = vmul.f32 %v454_v34, %v449_v33 }
 0x1a8   :  { %v324_v36 = vsel %vm314_vm4, %v323_v35, 0.0 }
 0x1a9   :  { %325 = vadd.xlane.f32.xlu0 %v324_v36 }
 0x21c   :  { %v326_v37 = vpop.xlane.xlu0 %325 }
 0x21d   :  { %v327_v38 = vmax.f32 %v326_v37, 1e-30 }
 0x21f   :  { %455 = vrcp.f32 %v327_v38 }
 0x225   :  { %v456_v39 = vpop.eup %455 }
 0x226   :  { %v329_v40 = vmul.f32 %v456_v39, %v323_v35 }
 0x228   :  { %349 = vmatmul.f32.vlgmr.msrb.gmra.mxu0 %v329_v40  ;;  %380 = vst [vmem:[#allocation4] sm:$0x3] %v329_v40  ;;  %v331_v41 = vrot.slane %v329_v40, 1 }
 0x229   :  { %402 = dma.vmem_to_hbm [thread:$0]  %s398_s4, 32, %s400_s18, [#allocation5]  }
 0x22a   :  { %369 = vmatmul.f32.vlgmr.msrb.gmra.mxu1 %v331_v41 }
 0x2a5   :  { %v350_v44 = vpop.f32.mrf.mxu0 }
 0x2a7   :  { %v370_v42 = vpop.f32.mrf.mxu1 }
 0x2a8   :  { %v375_v43 = vrot.slane %v370_v42, 7 }
 0x2aa   :  { %v376_v45 = vsel %vm141_vm2, %v375_v43, %v350_v44 }
 0x2ab   :  { %379 = vst.msk [vmem:[#allocation2] sm:$0x3] %vm378_vm5, %v376_v45 }
 0x2ac   :  { %391 = dma.vmem_to_hbm [thread:$0]  %s387_s20, 32, %s389_s23, [#allocation3]  }
 0x2ad   :  { %505 = dma.done.wait [#allocation3], 32  }
 0x2ae   :  { %506 = vsyncadd [#allocation3], 4294967264 }
 0x2af   :  { %507 = dma.done.wait [#allocation5], 32  }
 0x2b0   :  { %508 = vsyncadd [#allocation5], 4294967264 }
 0x2b1   :  { %411 = vsyncpa [#allocation3], 1 }
 0x2b2   :  { %412 = vsyncpa [#allocation5], 1 }

</bundles_post_ra>
